<compile_context>
chip_gen: v7x
topology: tpu7x:2x2x1
jax: 0.10.0
libtpu: 0.0.40
codegen_flags: <defaults>
</compile_context>

<pallas_src>
import jax
import jax.numpy as jnp
from jax.experimental import pallas as pl
from jax.experimental.pallas import tpu as pltpu


def _round_up(x, m):
    return (x + m - 1) // m * m


def _cdiv(a, b):
    return (a + b - 1) // b


def _patch_embed_kernel(p_ref, w_ref, b_ref, o_ref):
    # p_ref: (tm, K_pad) bf16  (patch rows, streamed per grid step)
    # w_ref: (K_pad, D_pad) bf16  (resident: constant index_map)
    # b_ref: (1, D_pad) f32       (resident)
    # o_ref: (tm, D_pad) out dtype
    acc = jnp.dot(p_ref[...], w_ref[...], preferred_element_type=jnp.float32)
    o_ref[...] = (acc + b_ref[...]).astype(o_ref.dtype)


def patch_embed_forward(x, weight, bias, patch_size, stride,
                        out_dtype=jnp.float32):
    """x: (B, C, H, W); weight: (D, C, ph, pw); bias: (D,).

    Returns (B, num_patches, D) in `out_dtype`, matching PyTorch
    PatchEmbed.forward with flatten=True and norm_layer=None (Identity).
    """
    B, C, H, W = x.shape
    D = weight.shape[0]
    ph, pw = patch_size
    assert stride == ph and stride == pw, "kernel assumes non-overlapping patches"
    gh = (H - ph) // stride + 1
    gw = (W - pw) // stride + 1
    n_patches = gh * gw
    M = B * n_patches
    K = C * ph * pw

    # VALID-conv semantics: leftover border pixels are dropped explicitly.
    if (gh * ph, gw * pw) != (H, W):
        x = x[:, :, :gh * ph, :gw * pw]

    # --- glue: patch gather in bf16 (fused by XLA into one copy under jit) ---
    xp = x.astype(jnp.bfloat16).reshape(B, C, gh, ph, gw, pw)
    xp = jnp.transpose(xp, (0, 2, 4, 1, 3, 5))           # (B, gh, gw, C, ph, pw)
    patches = xp.reshape(M, K)                           # (M, K) bf16
    w2d = weight.reshape(D, K).T.astype(jnp.bfloat16)    # (K, D) bf16
    b2d = bias.astype(jnp.float32).reshape(1, D)         # (1, D) f32

    # --- TPU-friendly lane dims (multiples of 128; usually already exact) ---
    K_pad = _round_up(K, 128)
    D_pad = _round_up(D, 128)
    out_bytes = jnp.dtype(out_dtype).itemsize

    # --- tile selection against an explicit VMEM budget (double-buffered) ---
    vmem_budget = 20 * 1024 * 1024          # safe on v5e / v6e / v7x scoped VMEM
    fixed = 2 * (K_pad * D_pad * 2) + 2 * (8 * D_pad * 4)   # weight + bias bufs
    per_row = 2 * (K_pad * 2 + D_pad * out_bytes)           # patch + out bufs
    tm_cap = max(16, min(2048, ((vmem_budget - fixed) // per_row) // 8 * 8))
    n_tiles = max(1, _cdiv(M, tm_cap))
    if n_tiles == 1 and M >= 16:
        n_tiles = 2                      # >= 2 parallel tiles for v7x megacore
    tm = _round_up(_cdiv(M, n_tiles), 8)  # keeps M padding waste < 8 rows/tile
    M_pad = tm * n_tiles

    if (M_pad - M) or (K_pad - K):
        patches = jnp.pad(patches, ((0, M_pad - M), (0, K_pad - K)))
    if (K_pad - K) or (D_pad - D):
        w2d = jnp.pad(w2d, ((0, K_pad - K), (0, D_pad - D)))
    if D_pad - D:
        b2d = jnp.pad(b2d, ((0, 0), (0, D_pad - D)))

    vmem_needed = fixed + per_row * tm
    vmem_limit = int(max(vmem_needed + (4 << 20), 16 << 20))

    cost = pl.CostEstimate(
        flops=2 * M_pad * K_pad * D_pad,
        transcendentals=0,
        bytes_accessed=(M_pad * K_pad * 2          # patch rows, read once
                        + K_pad * D_pad * 2        # weight, resident (one DMA)
                        + D_pad * 4                # bias, resident
                        + M_pad * D_pad * out_bytes),
    )

    out = pl.pallas_call(
        _patch_embed_kernel,
        out_shape=jax.ShapeDtypeStruct((M_pad, D_pad), out_dtype),
        grid_spec=pltpu.PrefetchScalarGridSpec(
            num_scalar_prefetch=0,
            grid=(n_tiles,),
            in_specs=[
                pl.BlockSpec((tm, K_pad), lambda i: (i, 0)),      # patch rows
                pl.BlockSpec((K_pad, D_pad), lambda i: (0, 0)),   # resident weight
                pl.BlockSpec((1, D_pad), lambda i: (0, 0)),       # resident bias
            ],
            out_specs=pl.BlockSpec((tm, D_pad), lambda i: (i, 0)),
        ),
        compiler_params=pltpu.CompilerParams(
            dimension_semantics=("parallel",),
            vmem_limit_bytes=vmem_limit),
        cost_estimate=cost,
    )(patches, w2d, b2d)

    if M_pad != M or D_pad != D:
        out = out[:M, :D]
    return out.reshape(B, n_patches, D)


if __name__ == "__main__":
    # Small shapes consistent with the module: img_size=16, patch_size=4,
    # stride=4, in_chans=4, embed_dim=32 -> 4x4 grid, 16 patches per image.
    B, C, H, W = 2, 4, 16, 16
    ph = pw = 4
    stride = 4
    D = 32

    key = jax.random.PRNGKey(0)
    kx, kw, kb = jax.random.split(key, 3)
    x = jax.random.normal(kx, (B, C, H, W), dtype=jnp.float32)
    weight = jax.random.normal(kw, (D, C, ph, pw), dtype=jnp.float32) * 0.02
    bias = jax.random.normal(kb, (D,), dtype=jnp.float32) * 0.02

    fwd = jax.jit(patch_embed_forward,
                  static_argnames=("patch_size", "stride", "out_dtype"))
    out = fwd(x, weight, bias, patch_size=(ph, pw), stride=stride)
    out = jax.block_until_ready(out)

    gh = (H - ph) // stride + 1
    gw = (W - pw) // stride + 1
    n_patches = gh * gw
    assert out.shape == (B, n_patches, D), f"bad shape {out.shape}"

    # Reference: f32 VALID conv (bf16 MXU operands -> loosened tolerance).
    ref = jax.lax.conv_general_dilated(
        x, weight, window_strides=(stride, stride), padding="VALID",
        dimension_numbers=("NCHW", "OIHW", "NCHW"))
    ref = ref.reshape(B, D, -1).transpose(0, 2, 1) + bias[None, None, :]
    assert jnp.allclose(out, ref, atol=2e-2, rtol=2e-2), "mismatch vs conv reference"

    print("KERNEL_OK")
</pallas_src>

<mosaic_0001>
module attributes {stable_mosaic.version = 11 : i64} {
  func.func @_patch_embed_kernel(%arg0: i32, %arg1: memref<16x128xbf16, #tpu.memory_space<vmem>>, %arg2: memref<128x128xbf16, #tpu.memory_space<vmem>>, %arg3: memref<1x128xf32, #tpu.memory_space<vmem>>, %arg4: memref<16x128xf32, #tpu.memory_space<vmem>>) attributes {dimension_semantics = [#tpu.dimension_semantics<parallel>], iteration_bounds = array<i64: 2>, scalar_prefetch = 0 : i64, scratch_operands = 0 : i64, tpu.core_type = #tpu.core_type<tc>, window_params = [{transform_indices = @transform_0, window_bounds = array<i64: 16, 128>}, {pipeline_mode = #tpu.pipeline_mode<synchronous>, transform_indices = @transform_1, window_bounds = array<i64: 128, 128>}, {pipeline_mode = #tpu.pipeline_mode<synchronous>, transform_indices = @transform_2, window_bounds = array<i64: 1, 128>}, {transform_indices = @transform_3, window_bounds = array<i64: 16, 128>}]} {
    %c0 = arith.constant 0 : index
    %c0_0 = arith.constant 0 : index
    %0 = vector.load %arg1[%c0, %c0_0] : memref<16x128xbf16, #tpu.memory_space<vmem>>, vector<16x128xbf16>
    %c0_1 = arith.constant 0 : index
    %c0_2 = arith.constant 0 : index
    %1 = vector.load %arg2[%c0_1, %c0_2] : memref<128x128xbf16, #tpu.memory_space<vmem>>, vector<128x128xbf16>
    %cst = arith.constant dense<0.000000e+00> : vector<16x128xf32>
    %2 = tpu.matmul %0, %1, %cst {dimension_numbers = #tpu.dot_dimension_numbers<[1], [0], [0], [1], [0, 0, 1, 1], [], []>} : vector<16x128xbf16>, vector<128x128xbf16>, vector<16x128xf32> -> vector<16x128xf32>
    %c0_3 = arith.constant 0 : index
    %c0_4 = arith.constant 0 : index
    %3 = vector.load %arg3[%c0_3, %c0_4] : memref<1x128xf32, #tpu.memory_space<vmem>>, vector<1x128xf32>
    %4 = vector.broadcast %3 : vector<1x128xf32> to vector<16x128xf32>
    %5 = arith.addf %2, %4 : vector<16x128xf32>
    %c0_5 = arith.constant 0 : index
    %c0_6 = arith.constant 0 : index
    %6 = vector.load %arg4[%c0_5, %c0_6] : memref<16x128xf32, #tpu.memory_space<vmem>>, vector<16x128xf32>
    tpu.vector_store %arg4[%c0_5, %c0_6], %5 {strides = array<i32>} : memref<16x128xf32, #tpu.memory_space<vmem>>, vector<16x128xf32>,
    return
  }
  func.func @transform_0(%arg0: i32) -> (i32, i32) {
    %c0_i32 = arith.constant 0 : i32
    %c0_i32_0 = arith.constant 0 : i32
    return %arg0, %c0_i32 : i32, i32
  }
  func.func @transform_1(%arg0: i32) -> (i32, i32) {
    %c0_i32 = arith.constant 0 : i32
    %c0_i32_0 = arith.constant 0 : i32
    %c0_i32_1 = arith.constant 0 : i32
    return %c0_i32, %c0_i32_0 : i32, i32
  }
  func.func @transform_2(%arg0: i32) -> (i32, i32) {
    %c0_i32 = arith.constant 0 : i32
    %c0_i32_0 = arith.constant 0 : i32
    %c0_i32_1 = arith.constant 0 : i32
    return %c0_i32, %c0_i32_0 : i32, i32
  }
  func.func @transform_3(%arg0: i32) -> (i32, i32) {
    %c0_i32 = arith.constant 0 : i32
    %c0_i32_0 = arith.constant 0 : i32
    return %arg0, %c0_i32 : i32, i32
  }
}

</mosaic_0001>

<bundles_post_ra>
// kernel: patch_embed_forward.1
= control target key start
LH: loop header
LB: loop body
LE: loop exit
PB: predicated region body
PF: predicated region fallthrough
CT: control target
= control target key end

     0   :  { %8 = vsyncpa [#allocation3], 0  ;;  %s693_s0 = inlined_call_operand.vmem [shape: bf16[32,128], index: 0, kind: input, shape index: {}]   ;;  %s694_s1 = inlined_call_operand.vmem [shape: bf16[128,128], index: 1, kind: input, shape index: {}]   ;;  %s695_s2 = inlined_call_operand.vmem [shape: f32[1,128], index: 2, kind: input, shape index: {}]   ;;  %s696_s3 = inlined_call_operand.hbm [shape: f32[32,128], index: 3, kind: output, shape index: {}]  }
   0x1   :  { %10 = vsyncpa [#allocation3 + $0x1], 0  ;;  %s564_s12 = smov 0   ;;  %s566_s13 = smov 0  }
   0x2   :  { %s568_s14 = smov 0   ;;  %s570_s15 = smov 0  }
   0x3 LB: > { %s585_s16 = sadd.s32 4294967295, %s537_s15   ;;  %s371_s17 = sadd.s32 4294967294, %s537_s15   ;;  %s537_s15 = sphi %s570_s15, %s702_s15   ;;  %s533_s14 = sphi %s568_s14, %s701_s14   ;;  %s529_s13 = sphi %s566_s13, %s700_s13   ;;  %s525_s12 = sphi %s564_s12, %s699_s12  }
   0x4   : > { %s589_s18 = sadd.s32 1, %s537_s15   ;;  %s91_s19 = sadd.s32 1, %s533_s14 }
   0x5   : > { %s88_s20 = ssub.s32 %s537_s15, %s589_s18  ;;  %p101_p0 = scmp.ne.s32.totalorder %s533_s14, %s529_s13 }
   0x6   : > { %p89_p1 = scmp.eq.s32.totalorder %s88_s20, 0  ;;  %p102_p2 = scmp.eq.s32.totalorder %s585_s16, 1 }
   0x7   : > { %p107_p3 = scmp.ne.s32.totalorder %s529_s13, %s525_s12  ;;  %p108_p4 = scmp.eq.s32.totalorder %s371_s17, 1 }
   0x8   : > { %s600_s21 = scalar_select %p89_p1, %s533_s14, %s91_s19  }
   0x9   : > { %p602_p5 = por %p102_p2, %p101_p0  ;;  %p606_p6 = por %p108_p4, %p107_p3 }
   0xa   : > { %p374_p7 = scmp.ge.s32.totalorder %s537_s15, 1  ;;  %p141_p8 = scmp.lt.s32.totalorder %s537_s15, 3 }
   0xc   : > { %p142_p9 = pnand %p374_p7, %p141_p8 }
   0xd   : > { %v466_v0 = vld [vmem:[%s694_s1] sm:$0xff] (!%p142_p9)   ;;  %v539_v1 = vmov (!%p142_p9), 0.0   ;;  %v467_v2 = vld [vmem:[%s694_s1 + $0x8] sm:$0xff] (!%p142_p9)   ;;  %vm540_vm0 = vmmov (!%p142_p9), 0   ;;  %s376_s28 = sshll.u32 (!%p142_p9), %s585_s16, 1  ;;  %v468_v3 = vld [vmem:[%s694_s1 + $0x10] sm:$0xff] (!%p142_p9)  }
   0xe   : > { %145 = sbr.rel (%p142_p9) target bundleno = 277 (0x115), region = 32  ;;  %403 = vmatprep.subr.bf16.mxu0 (!%p142_p9), %v539_v1  ;;  %419 = vmatprep.mubr.msk.bf16.mxu0 (!%p142_p9), %vm540_vm0, %v539_v1  ;;  %p166_p10 = scmp.lt.s32.totalorder (!%p142_p9), %s376_s28, 3  ;;  %v469_v4 = vld [vmem:[%s694_s1 + $0x18] sm:$0xff] (!%p142_p9)   ;;  %v470_v5 = vld [vmem:[%s694_s1 + $0x20] sm:$0xff] (!%p142_p9)   ;;  %v471_v6 = vld [vmem:[%s694_s1 + $0x28] sm:$0xff] (!%p142_p9)  }
   0xf   : > { %404 = vmatpush3.bf16.msra.mxu0 (!%p142_p9), %v466_v0  ;;  %v472_v7 = vld [vmem:[%s694_s1 + $0x30] sm:$0xff] (!%p142_p9)   ;;  %v473_v8 = vld [vmem:[%s694_s1 + $0x38] sm:$0xff] (!%p142_p9)   ;;  %s162_s27 = sand.u32 (!%p142_p9), 1, %s529_s13   ;;  %v378_v10 = vld [vmem:[%s695_s2] ss:$0 sm:$0xff] (!%p142_p9)  ;;  %s393_s6 = sshll.u32 (!%p142_p9), %s585_s16, 8 }
  0x10   : > { %405 = vmatprep.subr.bf16.mxu0 (!%p142_p9), %v539_v1  ;;  %s650_s9 = scalar_lea.hbm (!%p142_p9), %s696_s3, %s393_s6  ;;  %s652_s10 = scalar_lea.sflag (!%p142_p9), [#allocation3], %s162_s27 }
  0x11   : > { %s541_s11 = smov (!%p142_p9), [#allocation2]  }
  0x12   : > { %s479_s17 = sshll.u32 (!%p142_p9), %s541_s11, 4  ;;  %s480_s17 = int_to_ptr.vmem [resolvable:$false] %s479_s17 }
  0x13   : > { %406 = vmatpush3.bf16.msra.mxu0 (!%p142_p9), %v467_v2  ;;  %s481_s19 = scalar_lea.vmem (!%p142_p9), %s480_s17, 512 }
  0x14   : > { %407 = vmatprep.subr.bf16.mxu0 (!%p142_p9), %v539_v1 }
  0x15   : > { %s704_s28 = smov (!%p166_p10, %s376_s28), 3 }
  0x16   : > { %s377_s4 = sshll.u32 %s704_s28, 2  ;;  %s375_s28 = sshll.u32 %s162_s27, 4 }
  0x17   : > { %s169_s7 = scalar_lea.vmem %s693_s0, %s377_s4  ;;  %408 = vmatpush3.bf16.msra.mxu0 %v468_v3  ;;  %s164_s4 = scalar_lea.vmem [#allocation2], %s375_s28 }
  0x18   : > { %409 = vmatprep.subr.bf16.mxu0 %v539_v1  ;;  %v474_v9 = vld [vmem:[%s169_s7] sm:$0xff]   ;;  %s309_s5 = sshll.u32 %s164_s4, 4  ;;  %s645_s5 = int_to_ptr.vmem [resolvable:$true] %s309_s5 }
  0x19   : > { %s475_s16 = scalar_lea.vmem %s645_s5, 256  ;;  %p482_p0 = scmp.lt.s32.totalorder %s645_s5, %s480_s17 }
  0x1a   : > { %p476_p11 = scmp.ne.s32.totalorder %s645_s5, %s475_s16  ;;  %p483_p1 = scmp.lt.s32.totalorder %s481_s19, %s475_s16 }
  0x1b   : > { %410 = vmatpush3.bf16.msra.mxu0 %v469_v4 }
  0x1c   : > { %411 = vmatprep.subr.bf16.mxu0 %v539_v1  ;;  %p477_p12 = pnand %p476_p11, %p602_p5  ;;  %p484_p2 = por %p483_p1, %p482_p0 }
  0x1e   : > { %p478_p13 = pneg %p477_p12 }
  0x1f   : > { %412 = vmatpush3.bf16.msra.mxu0 %v470_v5 }
  0x20   : > { %413 = vmatprep.subr.bf16.mxu0 %v539_v1  ;;  %p485_p3 = pnand %p484_p2, %p478_p13 }
  0x23   : > { %414 = vmatpush3.bf16.msra.mxu0 %v471_v6 }
  0x24   : > { %415 = vmatprep.subr.bf16.mxu0 %v539_v1 }
  0x27   : > { %416 = vmatpush3.bf16.msra.mxu0 %v472_v7 }
  0x28   : > { %417 = vmatprep.subr.bf16.mxu0 %v539_v1 }
  0x2b   : > { %418 = vmatpush3.bf16.msra.mxu0 %v473_v8 }
  0x2e   : > { %420 = vmatmul.mubr.bf16.vlgmr.msra.gmra.mrb[0].mxu0 %v474_v9 }
 0x101   : > { %v286_v11 = vpop.f32.mrb[0].mxu0 }
 0x102   : > { %v287_v12 = vadd.f32 %v378_v10, %v286_v11  ;;  %v421_v13 = vpop.f32.mrb[1].mxu0 }
 0x103   : > { %v289_v14 = vpop.f32.mrb[2].mxu0 }
 0x104   : > { %293 = vst [vmem:[%s164_s4] sm:$0xff] %v287_v12  ;;  %v290_v15 = vadd.f32 %v378_v10, %v289_v14  ;;  %v422_v16 = vpop.f32.mrb[3].mxu0 }
 0x106   : > { %294 = vst [vmem:[%s164_s4 + $0x8] sm:$0xff] %v290_v15 }
 0x107   : > { %488 = shalt.err (!%p485_p3)
}
 0x108   : > { %s489_s20 = scalar_lea.hbm %s650_s9, 256  ;;  %s493_s26 = scalar_lea.hbm %s696_s3, 512 }
 0x109   : > { %p490_p4 = scmp.ne.s32.totalorder %s650_s9, %s489_s20  ;;  %p494_p9 = scmp.lt.u32.totalorder %s650_s9, %s696_s3 }
 0x10a   : > { %p495_p10 = scmp.lt.u32.totalorder %s493_s26, %s489_s20  ;;  %p497_p12 = scmp.lt.u32.totalorder %s489_s20, %s650_s9 }
 0x10b   : > { %p491_p7 = pnand %p490_p4, %p602_p5 }
 0x10c   : > { %p496_p11 = por %p495_p10, %p494_p9 }
 0x10d   : > { %p492_p8 = pneg %p491_p7 }
 0x10e   : > { %p498_p13 = por %p497_p12, %p496_p11 }
 0x110   : > { %p499_p0 = pnand %p498_p13, %p492_p8 }
 0x112   : > { %502 = shalt.err (!%p499_p0)
}
 0x113   : > { %s542_s29 = smov 128   ;;  %s543_s30 = smov 8  }
 0x114   : > { %423 = dma.vmem_to_hbm [thread:$0]  (%p602_p5), %s645_s5, 256, %s650_s9, %s652_s10, %s542_s29, %s542_s29, %s543_s30  }
 0x115 PF: > { %p429_p1 = scmp.ge.s32.totalorder %s537_s15, 2  ;;  %s324_s4 = sand.u32 1, %s525_s12  }
 0x116   : > { %s325_s6 = scalar_lea.sflag [#allocation3], %s324_s4 }
 0x117   : > { %p426_p2 = pnand %p429_p1, %p606_p6 }
 0x119   : > { %520 = dma.done.wait (!%p426_p2), %s325_s6, 256  }
 0x11a   : > { %522 = vsyncadd (!%p426_p2), %s325_s6, 4294967040  ;;  %p13_p3 = scmp.ge.s32.totalorder %s589_s18, 4   ;;  %s699_s12 = smov %s529_s13 }
 0x11b   : > { %s700_s13 = smov %s533_s14  ;;  %s701_s14 = smov %s600_s21 }
 0x11c   : > { %s702_s15 = smov %s589_s18  ;;  %15 = sbr.rel (!%p13_p3) target bundleno = 3 (0x3), region = 67 }
 0x123   :  { %330 = vsyncpa [#allocation3], 1 }
 0x124   :  { %332 = vsyncpa [#allocation3 + $0x1], 1 }

</bundles_post_ra>
